<compile_context>
chip_gen: v6e
topology: v6e:2x2x1
jax: 0.10.0
libtpu: 0.0.40
codegen_flags: <defaults>
</compile_context>

<pallas_src>
import functools

import jax
import jax.numpy as jnp
import numpy as np
from jax.experimental import pallas as pl
from jax.experimental.pallas import tpu as pltpu

LANE = 128


# ---------------------------------------------------------------------------
# Fused Pallas kernel (one grid step == one query, S = n_support + 1 rows)
# ---------------------------------------------------------------------------
def _context_mlp_kernel(x_ref, wqkv_ref, bd_ref, w0a_ref, w0b_ref, b0_ref,
                        w1_ref, b1_ref, o_ref, *, n_tok):
    """Fused ContextMLP forward for one query.

    x_ref    : (1, n_tok+2, d_pad) bf16 -- rows [0, n_tok) = context tokens
               (support rows + query row), row n_tok = neg prototype,
               row n_tok+1 = pos prototype.
    wqkv_ref : (d_pad, 3*d_pad) bf16    -- [Wq | Wk | Wv], zero-padded.
    bd_ref   : (d_pad, d_pad)   f32     -- block-diagonal head-sum matrix with
                                           the softmax scale folded in.
    w0a_ref  : (d_pad, h_pad)   bf16    -- w0 rows multiplying the attention
                                           output (first half of the concat).
    w0b_ref  : (d_pad, h_pad)   bf16    -- w0 rows multiplying the original
                                           embedding (second half of concat).
    b0/b1    : (1, h_pad)       f32
    w1_ref   : (h_pad, h_pad)   bf16
    o_ref    : (1, n_tok, h_pad) f32
    """
    x = x_ref[0]                                       # (n_tok+2, d_pad) bf16
    d_pad = x.shape[-1]

    # Single stacked QKV projection for all context rows + both prototypes.
    qkv = jnp.dot(x, wqkv_ref[...], preferred_element_type=jnp.float32)

    q0 = qkv[:n_tok, :d_pad]                           # token-0 queries
    k0 = qkv[:n_tok, d_pad:2 * d_pad]
    v0 = qkv[:n_tok, 2 * d_pad:]
    k1 = qkv[n_tok:n_tok + 1, d_pad:2 * d_pad]         # neg prototype k/v
    v1 = qkv[n_tok:n_tok + 1, 2 * d_pad:]
    k2 = qkv[n_tok + 1:, d_pad:2 * d_pad]              # pos prototype k/v
    v2 = qkv[n_tok + 1:, 2 * d_pad:]

    # Head-wise q.k reduction broadcast back to full lane width via a
    # block-diagonal matmul (scale already folded into bd): every lane j of
    # the result holds the score of head(j).  Lane-dense, no 16-wide slices.
    bd = bd_ref[...]
    s0 = jnp.dot(q0 * k0, bd, preferred_element_type=jnp.float32)
    s1 = jnp.dot(q0 * k1, bd, preferred_element_type=jnp.float32)
    s2 = jnp.dot(q0 * k2, bd, preferred_element_type=jnp.float32)

    # 3-token softmax (elementwise per lane), EUP reciprocal for the divide.
    m = jnp.maximum(jnp.maximum(s0, s1), s2)
    e0 = jnp.exp(s0 - m)
    e1 = jnp.exp(s1 - m)
    e2 = jnp.exp(s2 - m)
    inv = pl.reciprocal(e0 + e1 + e2, approx=True)
    attn0 = (e0 * v0 + e1 * v1 + e2 * v2) * inv        # (n_tok, d_pad) f32

    # fc0 over concat([attn0, x0]) without materializing the concat.
    x0 = x[:n_tok]                                     # (n_tok, d_pad) bf16
    h = jnp.dot(attn0.astype(jnp.bfloat16), w0a_ref[...],
                preferred_element_type=jnp.float32)
    h = h + jnp.dot(x0, w0b_ref[...], preferred_element_type=jnp.float32)
    h = h + b0_ref[...]
    h = jnp.where(h >= 0, h, 0.01 * h)                 # LeakyReLU(0.01)

    y = jnp.dot(h.astype(jnp.bfloat16), w1_ref[...],
                preferred_element_type=jnp.float32)
    y = y + b1_ref[...]
    o_ref[0] = y.astype(o_ref.dtype)                   # single full-width store


# ---------------------------------------------------------------------------
# Wrapper: JAX glue + padding/casting + pallas_call
# ---------------------------------------------------------------------------
def _pad2(w, rows, cols):
    return jnp.pad(w, ((0, rows - w.shape[0]), (0, cols - w.shape[1])))


def _round_up(n, m):
    return ((n + m - 1) // m) * m


def context_mlp_forward(s_emb, q_emb, params, num_heads=2):
    n_support, d = s_emb.shape
    n_query = q_emb.shape[0]
    n_shot = n_support // 2
    Q, S = n_query, n_support + 1
    hidden = params["w1"].shape[1]
    hd = d // num_heads
    d_pad = _round_up(d, LANE)
    h_pad = _round_up(hidden, LANE)

    # --- JAX glue: build per-query slab [context rows | neg proto | pos proto]
    s_rep = jnp.broadcast_to(s_emb[None, :, :], (Q, n_support, d))
    all_emb = jnp.concatenate([s_rep, q_emb[:, None, :]], axis=1)     # (Q, S, d)
    neg = jnp.mean(all_emb[:, :n_shot], axis=1, keepdims=True)        # (Q, 1, d)
    pos = jnp.mean(all_emb[:, n_shot:2 * n_shot], axis=1, keepdims=True)
    x_stacked = jnp.concatenate([all_emb, neg, pos], axis=1)          # (Q, S+2, d)
    x_stacked = jnp.pad(
        x_stacked, ((0, 0), (0, 0), (0, d_pad - d))).astype(jnp.bfloat16)

    # --- pad & cast parameters (one-time; amortized at load time in a model)
    w_qkv = params["w_qkv"]                                           # (d, 3d)
    wq, wk, wv = w_qkv[:, :d], w_qkv[:, d:2 * d], w_qkv[:, 2 * d:]
    wqkv_pad = jnp.concatenate(
        [_pad2(wq, d_pad, d_pad), _pad2(wk, d_pad, d_pad),
         _pad2(wv, d_pad, d_pad)], axis=1).astype(jnp.bfloat16)       # (d_pad, 3*d_pad)

    # Block-diagonal head-sum matrix with the softmax scale folded in.
    lane = jnp.arange(d_pad)
    same_head = ((lane[:, None] // hd) == (lane[None, :] // hd)) \
        & (lane[:, None] < d) & (lane[None, :] < d)
    bd = same_head.astype(jnp.float32) * (hd ** -0.5)                 # (d_pad, d_pad)

    w0 = params["w0"]                                                 # (2d, hidden)
    w0a = _pad2(w0[:d], d_pad, h_pad).astype(jnp.bfloat16)
    w0b = _pad2(w0[d:], d_pad, h_pad).astype(jnp.bfloat16)
    b0 = jnp.pad(params["b0"], (0, h_pad - hidden)).reshape(1, h_pad)
    w1 = _pad2(params["w1"], h_pad, h_pad).astype(jnp.bfloat16)
    b1 = jnp.pad(params["b1"], (0, h_pad - hidden)).reshape(1, h_pad)

    kernel = functools.partial(_context_mlp_kernel, n_tok=S)
    out_pad = pl.pallas_call(
        kernel,
        out_shape=jax.ShapeDtypeStruct((Q, S, h_pad), jnp.float32),
        grid=(Q,),
        in_specs=[
            pl.BlockSpec((1, S + 2, d_pad), lambda i: (i, 0, 0)),     # per-query slab
            pl.BlockSpec((d_pad, 3 * d_pad), lambda i: (0, 0)),       # resident weights
            pl.BlockSpec((d_pad, d_pad), lambda i: (0, 0)),
            pl.BlockSpec((d_pad, h_pad), lambda i: (0, 0)),
            pl.BlockSpec((d_pad, h_pad), lambda i: (0, 0)),
            pl.BlockSpec((1, h_pad), lambda i: (0, 0)),
            pl.BlockSpec((h_pad, h_pad), lambda i: (0, 0)),
            pl.BlockSpec((1, h_pad), lambda i: (0, 0)),
        ],
        out_specs=pl.BlockSpec((1, S, h_pad), lambda i: (i, 0, 0)),
        compiler_params=pltpu.CompilerParams(
            dimension_semantics=("parallel",)),
    )(x_stacked, wqkv_pad, bd, w0a, w0b, b0, w1, b1)

    out = out_pad[:, :, :hidden]                                      # drop lane padding
    s_super = out[0, :-1, :]                                          # (n_support, hidden)
    q_super = out[:, -1, :]                                           # (n_query, hidden)
    return s_super[None], q_super[None], out


# ---------------------------------------------------------------------------
# Pure-JAX reference (mirrors the PyTorch module exactly) for self-check
# ---------------------------------------------------------------------------
def reference_forward(s_emb, q_emb, params, num_heads=2):
    n_support, d = s_emb.shape
    n_query = q_emb.shape[0]
    n_shot = n_support // 2
    hd = d // num_heads
    scale = hd ** -0.5

    s_rep = jnp.broadcast_to(s_emb[None, :, :], (n_query, n_support, d))
    all_emb = jnp.concatenate([s_rep, q_emb[:, None, :]], axis=1)
    Q, S = all_emb.shape[0], all_emb.shape[1]
    neg = jnp.broadcast_to(jnp.mean(all_emb[:, :n_shot], axis=1, keepdims=True), (Q, S, d))
    pos = jnp.broadcast_to(jnp.mean(all_emb[:, n_shot:2 * n_shot], axis=1, keepdims=True), (Q, S, d))
    x = jnp.stack([all_emb, neg, pos], axis=-2).reshape(Q * S, 3, d)

    qkv = jnp.einsum("bnd,de->bne", x, params["w_qkv"]).reshape(Q * S, 3, 3, num_heads, hd)
    qkv = jnp.transpose(qkv, (2, 0, 3, 1, 4))
    q, k, v = qkv[0], qkv[1], qkv[2]
    attn = jax.nn.softmax(jnp.einsum("bhnd,bhmd->bhnm", q, k) * scale, axis=-1)
    o = jnp.einsum("bhnm,bhmd->bhnd", attn, v)
    o = jnp.transpose(o, (0, 2, 1, 3)).reshape(Q * S, 3, d)

    feat = jnp.concatenate([o[:, 0, :], x[:, 0, :]], axis=-1)
    h = feat @ params["w0"] + params["b0"]
    h = jnp.where(h >= 0, h, 0.01 * h)
    h = h @ params["w1"] + params["b1"]
    out = h.reshape(Q, S, -1)
    return out[0, :-1, :][None], out[:, -1, :][None], out


# ---------------------------------------------------------------------------
# Deterministic parameter init (shapes from ContextMLP.__init__, pre_fc=0)
# ---------------------------------------------------------------------------
def init_params(key, inp_dim, hidden_dim):
    k1, k2, k3, k4, k5 = jax.random.split(key, 5)
    d = inp_dim
    return {
        "w_qkv": jax.random.normal(k1, (d, 3 * d), jnp.float32) / np.sqrt(d),
        "w0": jax.random.normal(k2, (2 * d, hidden_dim), jnp.float32) / np.sqrt(2 * d),
        "b0": jax.random.normal(k3, (hidden_dim,), jnp.float32) * 0.01,
        "w1": jax.random.normal(k4, (hidden_dim, hidden_dim), jnp.float32) / np.sqrt(hidden_dim),
        "b1": jax.random.normal(k5, (hidden_dim,), jnp.float32) * 0.01,
    }


if __name__ == "__main__":
    key = jax.random.PRNGKey(0)
    k_s, k_q, k_p = jax.random.split(key, 3)

    inp_dim, hidden_dim = 32, 32
    n_support, n_query = 4, 2

    s_emb = jax.random.normal(k_s, (n_support, inp_dim), jnp.float32)
    q_emb = jax.random.normal(k_q, (n_query, inp_dim), jnp.float32)
    params = init_params(k_p, inp_dim, hidden_dim)

    outs = context_mlp_forward(s_emb, q_emb, params, num_heads=2)
    outs = jax.block_until_ready(outs)

    refs = reference_forward(s_emb, q_emb, params, num_heads=2)
    # bf16 MXU inputs + approx reciprocal -> loosened tolerance (f32 accumulate
    # keeps the error small, but above the old 1e-4).
    for o, r in zip(outs, refs):
        np.testing.assert_allclose(np.asarray(o), np.asarray(r), rtol=5e-2, atol=5e-2)

    print("KERNEL_OK")
</pallas_src>

<mosaic_0001>
module attributes {stable_mosaic.version = 11 : i64} {
  func.func @_context_mlp_kernel(%arg0: i32, %arg1: memref<1x7x128xbf16, #tpu.memory_space<vmem>>, %arg2: memref<128x384xbf16, #tpu.memory_space<vmem>>, %arg3: memref<128x128xf32, #tpu.memory_space<vmem>>, %arg4: memref<128x128xbf16, #tpu.memory_space<vmem>>, %arg5: memref<128x128xbf16, #tpu.memory_space<vmem>>, %arg6: memref<1x128xf32, #tpu.memory_space<vmem>>, %arg7: memref<128x128xbf16, #tpu.memory_space<vmem>>, %arg8: memref<1x128xf32, #tpu.memory_space<vmem>>, %arg9: memref<1x5x128xf32, #tpu.memory_space<vmem>>) attributes {dimension_semantics = [#tpu.dimension_semantics<parallel>], iteration_bounds = array<i64: 2>, scalar_prefetch = 0 : i64, scratch_operands = 0 : i64, tpu.core_type = #tpu.core_type<tc>, window_params = [{transform_indices = @transform_0, window_bounds = array<i64: 1, 7, 128>}, {pipeline_mode = #tpu.pipeline_mode<synchronous>, transform_indices = @transform_1, window_bounds = array<i64: 128, 384>}, {pipeline_mode = #tpu.pipeline_mode<synchronous>, transform_indices = @transform_2, window_bounds = array<i64: 128, 128>}, {pipeline_mode = #tpu.pipeline_mode<synchronous>, transform_indices = @transform_3, window_bounds = array<i64: 128, 128>}, {pipeline_mode = #tpu.pipeline_mode<synchronous>, transform_indices = @transform_4, window_bounds = array<i64: 128, 128>}, {pipeline_mode = #tpu.pipeline_mode<synchronous>, transform_indices = @transform_5, window_bounds = array<i64: 1, 128>}, {pipeline_mode = #tpu.pipeline_mode<synchronous>, transform_indices = @transform_6, window_bounds = array<i64: 128, 128>}, {pipeline_mode = #tpu.pipeline_mode<synchronous>, transform_indices = @transform_7, window_bounds = array<i64: 1, 128>}, {transform_indices = @transform_8, window_bounds = array<i64: 1, 5, 128>}]} {
    %c0 = arith.constant 0 : index
    %c0_0 = arith.constant 0 : index
    %c0_1 = arith.constant 0 : index
    %0 = vector.load %arg1[%c0, %c0_0, %c0_1] : memref<1x7x128xbf16, #tpu.memory_space<vmem>>, vector<1x7x128xbf16>
    %1 = vector.shape_cast %0 : vector<1x7x128xbf16> to vector<7x128xbf16>
    %c0_2 = arith.constant 0 : index
    %c0_3 = arith.constant 0 : index
    %2 = vector.load %arg2[%c0_2, %c0_3] : memref<128x384xbf16, #tpu.memory_space<vmem>>, vector<128x384xbf16>
    %cst = arith.constant dense<0.000000e+00> : vector<7x384xf32>
    %3 = tpu.matmul %1, %2, %cst {dimension_numbers = #tpu.dot_dimension_numbers<[1], [0], [0], [1], [0, 0, 1, 1], [], []>} : vector<7x128xbf16>, vector<128x384xbf16>, vector<7x384xf32> -> vector<7x384xf32>
    %4 = vector.extract_strided_slice %3 {offsets = [0, 0], sizes = [5, 128], strides = [1, 1]} : vector<7x384xf32> to vector<5x128xf32>
    %5 = vector.extract_strided_slice %3 {offsets = [0, 128], sizes = [5, 128], strides = [1, 1]} : vector<7x384xf32> to vector<5x128xf32>
    %6 = vector.extract_strided_slice %3 {offsets = [0, 256], sizes = [5, 128], strides = [1, 1]} : vector<7x384xf32> to vector<5x128xf32>
    %7 = vector.extract_strided_slice %3 {offsets = [5, 128], sizes = [1, 128], strides = [1, 1]} : vector<7x384xf32> to vector<1x128xf32>
    %8 = vector.extract_strided_slice %3 {offsets = [5, 256], sizes = [1, 128], strides = [1, 1]} : vector<7x384xf32> to vector<1x128xf32>
    %9 = vector.extract_strided_slice %3 {offsets = [6, 128], sizes = [1, 128], strides = [1, 1]} : vector<7x384xf32> to vector<1x128xf32>
    %10 = vector.extract_strided_slice %3 {offsets = [6, 256], sizes = [1, 128], strides = [1, 1]} : vector<7x384xf32> to vector<1x128xf32>
    %c0_4 = arith.constant 0 : index
    %c0_5 = arith.constant 0 : index
    %11 = vector.load %arg3[%c0_4, %c0_5] : memref<128x128xf32, #tpu.memory_space<vmem>>, vector<128x128xf32>
    %12 = arith.mulf %4, %5 : vector<5x128xf32>
    %cst_6 = arith.constant dense<0.000000e+00> : vector<5x128xf32>
    %13 = tpu.matmul %12, %11, %cst_6 {dimension_numbers = #tpu.dot_dimension_numbers<[1], [0], [0], [1], [0, 0, 1, 1], [], []>} : vector<5x128xf32>, vector<128x128xf32>, vector<5x128xf32> -> vector<5x128xf32>
    %14 = vector.broadcast %7 : vector<1x128xf32> to vector<5x128xf32>
    %15 = arith.mulf %4, %14 : vector<5x128xf32>
    %cst_7 = arith.constant dense<0.000000e+00> : vector<5x128xf32>
    %16 = tpu.matmul %15, %11, %cst_7 {dimension_numbers = #tpu.dot_dimension_numbers<[1], [0], [0], [1], [0, 0, 1, 1], [], []>} : vector<5x128xf32>, vector<128x128xf32>, vector<5x128xf32> -> vector<5x128xf32>
    %17 = vector.broadcast %9 : vector<1x128xf32> to vector<5x128xf32>
    %18 = arith.mulf %4, %17 : vector<5x128xf32>
    %cst_8 = arith.constant dense<0.000000e+00> : vector<5x128xf32>
    %19 = tpu.matmul %18, %11, %cst_8 {dimension_numbers = #tpu.dot_dimension_numbers<[1], [0], [0], [1], [0, 0, 1, 1], [], []>} : vector<5x128xf32>, vector<128x128xf32>, vector<5x128xf32> -> vector<5x128xf32>
    %20 = arith.maximumf %13, %16 : vector<5x128xf32>
    %21 = arith.maximumf %20, %19 : vector<5x128xf32>
    %22 = arith.subf %13, %21 : vector<5x128xf32>
    %23 = math.exp %22 : vector<5x128xf32>
    %24 = arith.subf %16, %21 : vector<5x128xf32>
    %25 = math.exp %24 : vector<5x128xf32>
    %26 = arith.subf %19, %21 : vector<5x128xf32>
    %27 = math.exp %26 : vector<5x128xf32>
    %28 = arith.addf %23, %25 : vector<5x128xf32>
    %29 = arith.addf %28, %27 : vector<5x128xf32>
    %30 = tpu.reciprocal %29 {approx = true} : vector<5x128xf32> -> vector<5x128xf32>
    %31 = arith.mulf %23, %6 : vector<5x128xf32>
    %32 = vector.broadcast %8 : vector<1x128xf32> to vector<5x128xf32>
    %33 = arith.mulf %25, %32 : vector<5x128xf32>
    %34 = arith.addf %31, %33 : vector<5x128xf32>
    %35 = vector.broadcast %10 : vector<1x128xf32> to vector<5x128xf32>
    %36 = arith.mulf %27, %35 : vector<5x128xf32>
    %37 = arith.addf %34, %36 : vector<5x128xf32>
    %38 = arith.mulf %37, %30 : vector<5x128xf32>
    %39 = vector.extract_strided_slice %1 {offsets = [0, 0], sizes = [5, 128], strides = [1, 1]} : vector<7x128xbf16> to vector<5x128xbf16>
    %40 = arith.truncf %38 : vector<5x128xf32> to vector<5x128xbf16>
    %c0_9 = arith.constant 0 : index
    %c0_10 = arith.constant 0 : index
    %41 = vector.load %arg4[%c0_9, %c0_10] : memref<128x128xbf16, #tpu.memory_space<vmem>>, vector<128x128xbf16>
    %cst_11 = arith.constant dense<0.000000e+00> : vector<5x128xf32>
    %42 = tpu.matmul %40, %41, %cst_11 {dimension_numbers = #tpu.dot_dimension_numbers<[1], [0], [0], [1], [0, 0, 1, 1], [], []>} : vector<5x128xbf16>, vector<128x128xbf16>, vector<5x128xf32> -> vector<5x128xf32>
    %c0_12 = arith.constant 0 : index
    %c0_13 = arith.constant 0 : index
    %43 = vector.load %arg5[%c0_12, %c0_13] : memref<128x128xbf16, #tpu.memory_space<vmem>>, vector<128x128xbf16>
    %cst_14 = arith.constant dense<0.000000e+00> : vector<5x128xf32>
    %44 = tpu.matmul %39, %43, %cst_14 {dimension_numbers = #tpu.dot_dimension_numbers<[1], [0], [0], [1], [0, 0, 1, 1], [], []>} : vector<5x128xbf16>, vector<128x128xbf16>, vector<5x128xf32> -> vector<5x128xf32>
    %45 = arith.addf %42, %44 : vector<5x128xf32>
    %c0_15 = arith.constant 0 : index
    %c0_16 = arith.constant 0 : index
    %46 = vector.load %arg6[%c0_15, %c0_16] : memref<1x128xf32, #tpu.memory_space<vmem>>, vector<1x128xf32>
    %47 = vector.broadcast %46 : vector<1x128xf32> to vector<5x128xf32>
    %48 = arith.addf %45, %47 : vector<5x128xf32>
    %cst_17 = arith.constant 0.000000e+00 : f32
    %49 = vector.broadcast %cst_17 : f32 to vector<5x128xf32>
    %50 = arith.cmpf oge, %48, %49 : vector<5x128xf32>
    %cst_18 = arith.constant 0.00999999977 : f32
    %51 = vector.broadcast %cst_18 : f32 to vector<5x128xf32>
    %52 = arith.mulf %51, %48 : vector<5x128xf32>
    %53 = arith.select %50, %48, %52 : vector<5x128xi1>, vector<5x128xf32>
    %54 = arith.truncf %53 : vector<5x128xf32> to vector<5x128xbf16>
    %c0_19 = arith.constant 0 : index
    %c0_20 = arith.constant 0 : index
    %55 = vector.load %arg7[%c0_19, %c0_20] : memref<128x128xbf16, #tpu.memory_space<vmem>>, vector<128x128xbf16>
    %cst_21 = arith.constant dense<0.000000e+00> : vector<5x128xf32>
    %56 = tpu.matmul %54, %55, %cst_21 {dimension_numbers = #tpu.dot_dimension_numbers<[1], [0], [0], [1], [0, 0, 1, 1], [], []>} : vector<5x128xbf16>, vector<128x128xbf16>, vector<5x128xf32> -> vector<5x128xf32>
    %c0_22 = arith.constant 0 : index
    %c0_23 = arith.constant 0 : index
    %57 = vector.load %arg8[%c0_22, %c0_23] : memref<1x128xf32, #tpu.memory_space<vmem>>, vector<1x128xf32>
    %58 = vector.broadcast %57 : vector<1x128xf32> to vector<5x128xf32>
    %59 = arith.addf %56, %58 : vector<5x128xf32>
    %c0_24 = arith.constant 0 : index
    %c0_25 = arith.constant 0 : index
    %c0_26 = arith.constant 0 : index
    %60 = vector.load %arg9[%c0_24, %c0_25, %c0_26] : memref<1x5x128xf32, #tpu.memory_space<vmem>>, vector<1x5x128xf32>
    %61 = vector.shape_cast %60 : vector<1x5x128xf32> to vector<5x128xf32>
    %62 = vector.shape_cast %59 : vector<5x128xf32> to vector<1x5x128xf32>
    tpu.vector_store %arg9[%c0_24, %c0_25, %c0_26], %62 {strides = array<i32>} : memref<1x5x128xf32, #tpu.memory_space<vmem>>, vector<1x5x128xf32>,
    return
  }
  func.func @transform_0(%arg0: i32) -> (i32, i32, i32) {
    %c0_i32 = arith.constant 0 : i32
    %c0_i32_0 = arith.constant 0 : i32
    %c0_i32_1 = arith.constant 0 : i32
    return %arg0, %c0_i32, %c0_i32_0 : i32, i32, i32
  }
  func.func @transform_1(%arg0: i32) -> (i32, i32) {
    %c0_i32 = arith.constant 0 : i32
    %c0_i32_0 = arith.constant 0 : i32
    %c0_i32_1 = arith.constant 0 : i32
    return %c0_i32, %c0_i32_0 : i32, i32
  }
  func.func @transform_2(%arg0: i32) -> (i32, i32) {
    %c0_i32 = arith.constant 0 : i32
    %c0_i32_0 = arith.constant 0 : i32
    %c0_i32_1 = arith.constant 0 : i32
    return %c0_i32, %c0_i32_0 : i32, i32
  }
  func.func @transform_3(%arg0: i32) -> (i32, i32) {
    %c0_i32 = arith.constant 0 : i32
    %c0_i32_0 = arith.constant 0 : i32
    %c0_i32_1 = arith.constant 0 : i32
    return %c0_i32, %c0_i32_0 : i32, i32
  }
  func.func @transform_4(%arg0: i32) -> (i32, i32) {
    %c0_i32 = arith.constant 0 : i32
    %c0_i32_0 = arith.constant 0 : i32
    %c0_i32_1 = arith.constant 0 : i32
    return %c0_i32, %c0_i32_0 : i32, i32
  }
  func.func @transform_5(%arg0: i32) -> (i32, i32) {
    %c0_i32 = arith.constant 0 : i32
    %c0_i32_0 = arith.constant 0 : i32
    %c0_i32_1 = arith.constant 0 : i32
    return %c0_i32, %c0_i32_0 : i32, i32
  }
  func.func @transform_6(%arg0: i32) -> (i32, i32) {
    %c0_i32 = arith.constant 0 : i32
    %c0_i32_0 = arith.constant 0 : i32
    %c0_i32_1 = arith.constant 0 : i32
    return %c0_i32, %c0_i32_0 : i32, i32
  }
  func.func @transform_7(%arg0: i32) -> (i32, i32) {
    %c0_i32 = arith.constant 0 : i32
    %c0_i32_0 = arith.constant 0 : i32
    %c0_i32_1 = arith.constant 0 : i32
    return %c0_i32, %c0_i32_0 : i32, i32
  }
  func.func @transform_8(%arg0: i32) -> (i32, i32, i32) {
    %c0_i32 = arith.constant 0 : i32
    %c0_i32_0 = arith.constant 0 : i32
    %c0_i32_1 = arith.constant 0 : i32
    return %arg0, %c0_i32, %c0_i32_0 : i32, i32, i32
  }
}

</mosaic_0001>

<bundles_post_ra>
// kernel: tpu_custom_call.1
= control target key start
LH: loop header
LB: loop body
LE: loop exit
PB: predicated region body
PF: predicated region fallthrough
CT: control target
= control target key end

     0   :  { %13 = vsyncpa [#allocation3], 0  ;;  %s2308_s0 = inlined_call_operand.vmem [shape: bf16[2,7,128], index: 0, kind: input, shape index: {}]   ;;  %s2309_s1 = inlined_call_operand.hbm [shape: bf16[128,384], index: 1, kind: input, shape index: {}]   ;;  %s2310_s2 = inlined_call_operand.hbm [shape: f32[128,128], index: 2, kind: input, shape index: {}]   ;;  %s2311_s3 = inlined_call_operand.hbm [shape: bf16[128,128], index: 3, kind: input, shape index: {}]   ;;  %s2312_s4 = inlined_call_operand.hbm [shape: bf16[128,128], index: 4, kind: input, shape index: {}]   ;;  %s2313_s5 = inlined_call_operand.vmem [shape: f32[1,128], index: 5, kind: input, shape index: {}]   ;;  %s2314_s6 = inlined_call_operand.hbm [shape: bf16[128,128], index: 6, kind: input, shape index: {}]   ;;  %s2315_s7 = inlined_call_operand.vmem [shape: f32[1,128], index: 7, kind: input, shape index: {}]   ;;  %s2316_s8 = inlined_call_operand.vmem [shape: f32[2,5,128], index: 8, kind: output, shape index: {}]  }
   0x1   :  { %14 = vsyncpa [#allocation5], 0 }
   0x2   :  { %15 = vsyncpa [#allocation8], 0  ;;  %s2000_s27 = smov 0  }
   0x3 LB: > { %s1941_s28 = smov [#allocation4]   ;;  %s2006_s30 = sadd.s32 4294967295, %s1939_s27   ;;  %s1939_s27 = sphi %s2000_s27, %s21_s27  }
   0x4   : > { %s250_s29 = sshll.u32 %s1941_s28, 4  ;;  %p1320_p0 = scmp.ge.s32.totalorder %s1939_s27, 1  ;;  %s251_s29 = int_to_ptr.vmem [resolvable:$true] %s250_s29 }
   0x5   : > { %p225_p1 = scmp.lt.s32.totalorder %s1939_s27, 3  ;;  %p1695_p2 = scmp.eq.s32.totalorder %s2006_s30, 0 }
   0x6   : > { %s1942_s11 = smov [#allocation7]   ;;  %s1943_s13 = smov [#allocation2]  }
   0x7   : > { %p2011_p3 = pnand %p1320_p0, %p225_p1  ;;  %s276_s12 = sshll.u32 %s1942_s11, 4  ;;  %s2023_s12 = int_to_ptr.vmem [resolvable:$true] %s276_s12 }
   0x8   : > { %s237_s14 = sshll.u32 %s1943_s13, 4  ;;  %s1802_s16 = scalar_lea.vmem %s251_s29, 2048  ;;  %s2025_s14 = int_to_ptr.vmem [resolvable:$true] %s237_s14 }
   0x9   : > { %p1679_p4 = pneg %p2011_p3  ;;  %p1803_p7 = scmp.ne.s32.totalorder %s251_s29, %s1802_s16 }
   0xa   : > { %p1810_p10 = scmp.lt.s32.totalorder %s251_s29, %s251_s29  ;;  %p1811_p11 = scmp.lt.s32.totalorder %s1802_s16, %s1802_s16 }
   0xb   : > { %p2019_p5 = pnand %p1695_p2, %p1679_p4 }
   0xc   : > { %p1812_p12 = por %p1811_p11, %p1810_p10 }
   0xd   : > { %p2029_p6 = pneg %p2019_p5 }
   0xf   : > { %p1805_p8 = pnand %p1803_p7, %p2029_p6 }
  0x11   : > { %p1806_p9 = pneg %p1805_p8 }
  0x13   : > { %p1813_p13 = pnand %p1812_p12, %p1806_p9 }
  0x15   : > { %1816 = shalt.err (!%p1813_p13)
}
  0x16   : > { %s1944_s17 = smov 128   ;;  %s1945_s18 = smov 8  }
  0x17   : > { %1685 = dma.hbm_to_vmem [thread:$0]  (!%p2019_p5), %s2310_s2, 2048, %s251_s29, [#allocation5], %s1944_s17, %s1944_s17, %s1945_s18  }
  0x18   : > { %s1828_s21 = scalar_lea.vmem %s2023_s12, 1024  ;;  %p1836_p7 = scmp.lt.s32.totalorder %s2023_s12, %s2023_s12 }
  0x19   : > { %p1829_p0 = scmp.ne.s32.totalorder %s2023_s12, %s1828_s21  ;;  %p1837_p8 = scmp.lt.s32.totalorder %s1828_s21, %s1828_s21 }
  0x1b   : > { %p1831_p1 = pnand %p1829_p0, %p2029_p6  ;;  %p1838_p9 = por %p1837_p8, %p1836_p7 }
  0x1d   : > { %p1832_p4 = pneg %p1831_p1 }
  0x1f   : > { %p1839_p10 = pnand %p1838_p9, %p1832_p4 }
  0x21   : > { %1842 = shalt.err (!%p1839_p10)
}
  0x22   : > { %s1946_s22 = smov 64   ;;  %s1947_s23 = smov 4  }
  0x23   : > { %1691 = dma.hbm_to_vmem [thread:$0]  (!%p2019_p5), %s2312_s4, 1024, %s2023_s12, [#allocation8], %s1946_s22, %s1946_s22, %s1947_s23  }
  0x24   : > { %s1854_s26 = scalar_lea.vmem %s2025_s14, 3072  ;;  %p1862_p0 = scmp.lt.s32.totalorder %s2025_s14, %s2025_s14 }
  0x25   : > { %p1855_p11 = scmp.ne.s32.totalorder %s2025_s14, %s1854_s26  ;;  %p1863_p1 = scmp.lt.s32.totalorder %s1854_s26, %s1854_s26 }
  0x27   : > { %p1857_p12 = pnand %p1855_p11, %p2029_p6  ;;  %p1864_p4 = por %p1863_p1, %p1862_p0 }
  0x29   : > { %p1858_p13 = pneg %p1857_p12 }
  0x2b   : > { %p1865_p7 = pnand %p1864_p4, %p1858_p13 }
  0x2d   : > { %1868 = shalt.err (!%p1865_p7)
}
  0x2e   : > { %s1948_s28 = smov 192   ;;  %s1949_s29 = smov 12  }
  0x2f   : > { %1682 = dma.hbm_to_vmem [thread:$0]  (!%p2019_p5), %s2309_s1, 3072, %s2025_s14, [#allocation3], %s1948_s28, %s1948_s28, %s1949_s29  }
  0x30   : > { %s1950_s12 = smov [#allocation6]   ;;  %s1951_s17 = smov [#allocation9]  }
  0x31   : > { %s263_s16 = sshll.u32 %s1950_s12, 4  ;;  %s292_s18 = sshll.u32 %s1951_s17, 4  ;;  %s264_s16 = int_to_ptr.vmem [resolvable:$true] %s263_s16  ;;  %s293_s18 = int_to_ptr.vmem [resolvable:$true] %s292_s18 }
  0x32   : > { %s1880_s19 = scalar_lea.vmem %s264_s16, 1024  ;;  %p1888_p11 = scmp.lt.s32.totalorder %s264_s16, %s264_s16 }
  0x33   : > { %p1881_p8 = scmp.ne.s32.totalorder %s264_s16, %s1880_s19  ;;  %p1889_p12 = scmp.lt.s32.totalorder %s1880_s19, %s1880_s19 }
  0x35   : > { %p1883_p9 = pnand %p1881_p8, %p2029_p6  ;;  %p1890_p13 = por %p1889_p12, %p1888_p11 }
  0x37   : > { %p1884_p10 = pneg %p1883_p9 }
  0x39   : > { %p1891_p0 = pnand %p1890_p13, %p1884_p10 }
  0x3b   : > { %1894 = shalt.err (!%p1891_p0)
}
  0x3c   : > { %1688 = dma.hbm_to_vmem [thread:$0]  (!%p2019_p5), %s2311_s3, 1024, %s264_s16, [#allocation5], %s1946_s22, %s1946_s22, %s1947_s23  }
  0x3d   : > { %s1906_s21 = scalar_lea.vmem %s293_s18, 1024  ;;  %p1914_p8 = scmp.lt.s32.totalorder %s293_s18, %s293_s18 }
  0x3e   : > { %p1907_p1 = scmp.ne.s32.totalorder %s293_s18, %s1906_s21  ;;  %p1915_p9 = scmp.lt.s32.totalorder %s1906_s21, %s1906_s21 }
  0x40   : > { %p1909_p4 = pnand %p1907_p1, %p2029_p6  ;;  %p1916_p11 = por %p1915_p9, %p1914_p8 }
  0x42   : > { %p1910_p7 = pneg %p1909_p4 }
  0x44   : > { %p1917_p10 = pnand %p1916_p11, %p1910_p7 }
  0x46   : > { %1920 = shalt.err (!%p1917_p10)
}
  0x47   : > { %1694 = dma.hbm_to_vmem [thread:$0]  (!%p2019_p5), %s2314_s6, 1024, %s293_s18, [#allocation8], %s1946_s22, %s1946_s22, %s1947_s23  }
  0x48   : > { %318 = sbr.rel (%p2011_p3) target bundleno = 982 (0x3d6), region = 52 }
  0x4d   : > { %1926 = dma.done.wait (%p1695_p2), [#allocation3], 3072  }
  0x4e   : > { %1928 = vsyncadd (%p1695_p2), [#allocation3], 4294964224 }
  0x4f   : > { %1930 = dma.done.wait (%p1695_p2), [#allocation5], 3072  }
  0x50   : > { %1932 = vsyncadd (%p1695_p2), [#allocation5], 4294964224 }
  0x51   : > { %1934 = dma.done.wait (%p1695_p2), [#allocation8], 2048  }
  0x52   : > { %1936 = vsyncadd (%p1695_p2), [#allocation8], 4294965248  ;;  %v1952_v0 = vmov 0   ;;  %v1953_v1 = vmov 0.0   ;;  %vm1954_vm0 = vmmov 0   ;;  %p366_p2 = scmp.lt.s32.totalorder %s2006_s30, 1  ;;  %v704_v43 = vlaneseq }
  0x53   : > { %568 = vmatprep.mubr.bf16.mxu0 %v1952_v0  ;;  %1474 = vmatprep.subr.bf16.mxu1 %v1953_v1  ;;  %v1727_v2 = vld [vmem:[#allocation2 + $0xac] ss:$12 sps:$4 sm:$0xff]   ;;  %v1729_v3 = vld [vmem:[#allocation2 + $0xa8] ss:$12 sps:$4 sm:$0xff]   ;;  %v1732_v5 = vld [vmem:[#allocation2 + $0x90] ss:$12 sps:$4 sm:$0xff]  }
  0x54   : > { %1490 = vmatprep.mubr.msk.bf16.mxu1 %vm1954_vm0, %v1953_v1  ;;  %536 = vmatprep.subr.bf16.mxu0 %v1727_v2  ;;  %v1730_v4 = vld [vmem:[#allocation2 + $0x94] ss:$12 sps:$4 sm:$0xff]   ;;  %v1733_v6 = vld [vmem:[#allocation2 + $0x7c] ss:$12 sps:$4 sm:$0xff]   ;;  %v1735_v7 = vld [vmem:[#allocation2 + $0x78] ss:$12 sps:$4 sm:$0xff]  }
  0x55   : > { %537 = vmatpush1.bf16.msra.mxu0 %v1729_v3  ;;  %v1736_v8 = vld [vmem:[#allocation2 + $0x64] ss:$12 sps:$4 sm:$0xff]   ;;  %v1738_v9 = vld [vmem:[#allocation2 + $0x60] ss:$12 sps:$4 sm:$0xff]   ;;  %v1741_v13 = vld [vmem:[#allocation2 + $0x48] ss:$12 sps:$4 sm:$0xff]  }
  0x56   : > { %538 = vmatprep.subr.bf16.mxu0 %v1730_v4  ;;  %v1751_v10 = vld [vmem:[#allocation2 + $0xb0] ss:$12 sps:$4 sm:$0xff]   ;;  %v1739_v11 = vld [vmem:[#allocation2 + $0x4c] ss:$12 sps:$4 sm:$0xff]   ;;  %v1742_v14 = vld [vmem:[#allocation2 + $0x34] ss:$12 sps:$4 sm:$0xff]  }
  0x57   : > { %1475 = vmatpush3.bf16.msra.mxu1 %v1751_v10  ;;  %v1752_v12 = vld [vmem:[#allocation2 + $0x98] ss:$12 sps:$4 sm:$0xff]   ;;  %v1753_v15 = vld [vmem:[#allocation2 + $0x80] ss:$12 sps:$4 sm:$0xff]   ;;  %s2321_s30 = smov (!%p366_p2, %s2006_s30), 1  ;;  %v2122_v27 = vld [vmem:[#allocation4 + $0x70] sm:$0xff] }
  0x58   : > { %1476 = vmatprep.subr.bf16.mxu1 %v1953_v1  ;;  %v1744_v16 = vld [vmem:[#allocation2 + $0x30] ss:$12 sps:$4 sm:$0xff]   ;;  %v1754_v18 = vld [vmem:[#allocation2 + $0x68] ss:$12 sps:$4 sm:$0xff]   ;;  %v1747_v19 = vld [vmem:[#allocation2 + $0x18] ss:$12 sps:$4 sm:$0xff]  }
  0x59   : > { %539 = vmatpush1.bf16.msra.mxu0 %v1732_v5  ;;  %v1745_v17 = vld [vmem:[#allocation2 + $0x1c] ss:$12 sps:$4 sm:$0xff]   ;;  %s1333_s9 = sshll.u32 %s2321_s30, 2  ;;  %v1748_v20 = vld [vmem:[#allocation2 + $0x4] ss:$12 sps:$4 sm:$0xff]   ;;  %v2217_v44 = vshrl.u32 %v704_v43, 7 }
  0x5a   : > { %540 = vmatprep.subr.bf16.mxu0 %v1733_v6  ;;  %v1755_v21 = vld [vmem:[#allocation2 + $0x50] ss:$12 sps:$4 sm:$0xff]   ;;  %v1750_v22 = vld [vmem:[#allocation2] ss:$12 sps:$4 sm:$0xff]   ;;  %s369_s22 = scalar_lea.vmem %s2308_s0, %s1333_s9  ;;  %v1756_v23 = vld [vmem:[#allocation2 + $0x38] ss:$12 sps:$4 sm:$0xff]  }
  0x5b   : > { %1477 = vmatpush3.bf16.msra.mxu1 %v1752_v12  ;;  %v2116_v24 = vld [vmem:[%s369_s22] sm:$0xf]  ;;  %v2119_v25 = vld [vmem:[#allocation4 + $0x78] sm:$0xff]  ;;  %v2126_v28 = vld [vmem:[#allocation4 + $0x68] sm:$0xff]  ;;  %v706_v45 = vsub.s32 5, %v2217_v44  ;;  %v781_v57 = vsub.s32 6, %v2217_v44 }
  0x5c   : > { %1478 = vmatprep.subr.bf16.mxu1 %v1953_v1  ;;  %v1757_v26 = vld [vmem:[#allocation2 + $0x20] ss:$12 sps:$4 sm:$0xff]   ;;  %v1758_v29 = vld [vmem:[#allocation2 + $0x8] ss:$12 sps:$4 sm:$0xff]   ;;  %v2139_v31 = vld [vmem:[#allocation4 + $0x58] sm:$0xff]  ;;  %s1334_s28 = sshll.u32 %s2321_s30, 3 }
  0x5d   : > { %541 = vmatpush1.bf16.msra.mxu0 %v1735_v7  ;;  %v2132_v30 = vld [vmem:[#allocation4 + $0x60] sm:$0xff]  ;;  %v2144_v32 = vld [vmem:[#allocation4 + $0x50] sm:$0xff]  ;;  %v2149_v33 = vld [vmem:[#allocation4 + $0x48] sm:$0xff]  ;;  %s373_s16 = scalar_lea.vmem %s2316_s8, %s1334_s28 }
  0x5e   : > { %542 = vmatprep.subr.bf16.mxu0 %v1736_v8  ;;  %v2155_v34 = vld [vmem:[#allocation4 + $0x40] sm:$0xff]  ;;  %v2161_v35 = vld [vmem:[#allocation4 + $0x38] sm:$0xff]  ;;  %v2167_v36 = vld [vmem:[#allocation4 + $0x30] sm:$0xff] }
  0x5f   : > { %1479 = vmatpush3.bf16.msra.mxu1 %v1753_v15  ;;  %v2173_v37 = vld [vmem:[#allocation4 + $0x28] sm:$0xff]  ;;  %v2179_v38 = vld [vmem:[#allocation4 + $0x20] sm:$0xff]  ;;  %v2185_v39 = vld [vmem:[#allocation4 + $0x18] sm:$0xff] }
  0x60   : > { %1480 = vmatprep.subr.bf16.mxu1 %v1953_v1  ;;  %v2191_v40 = vld [vmem:[#allocation4 + $0x10] sm:$0xff]  ;;  %v618_v41 = vld [vmem:[#allocation4 + $0x8] sm:$0xff]  ;;  %v617_v42 = vld [vmem:[#allocation4] sm:$0xff] }
  0x61   : > { %543 = vmatpush1.bf16.msra.mxu0 %v1738_v9  ;;  %v1759_v60 = vld [vmem:[#allocation7 + $0x38] sm:$0xff]   ;;  %v1760_v61 = vld [vmem:[#allocation7 + $0x30] sm:$0xff]   ;;  %v1762_v63 = vld [vmem:[#allocation7 + $0x28] sm:$0xff]  }
  0x62   : > { %544 = vmatprep.subr.bf16.mxu0 %v1739_v11  ;;  %v1761_v62 = vld [vmem:[#allocation6 + $0x38] sm:$0xff]   ;;  %v1763_v0 = vld [vmem:[#allocation6 + $0x30] sm:$0xff]   ;;  %v1764_v2 = vld [vmem:[#allocation7 + $0x20] sm:$0xff]  }
  0x63   : > { %1481 = vmatpush3.bf16.msra.mxu1 %v1754_v18  ;;  %v1765_v3 = vld [vmem:[#allocation6 + $0x28] sm:$0xff]   ;;  %v1766_v4 = vld [vmem:[#allocation7 + $0x18] sm:$0xff]   ;;  %v1767_v5 = vld [vmem:[#allocation6 + $0x20] sm:$0xff]  }
  0x64   : > { %1482 = vmatprep.subr.bf16.mxu1 %v1953_v1  ;;  %v1768_v6 = vld [vmem:[#allocation7 + $0x10] sm:$0xff]   ;;  %v1769_v7 = vld [vmem:[#allocation6 + $0x18] sm:$0xff]   ;;  %v1770_v8 = vld [vmem:[#allocation7 + $0x8] sm:$0xff]  }
  0x65   : > { %545 = vmatpush1.bf16.msra.mxu0 %v1741_v13  ;;  %v1771_v9 = vld [vmem:[#allocation6 + $0x10] sm:$0xff]   ;;  %v1772_v10 = vld [vmem:[#allocation7] sm:$0xff]   ;;  %v1773_v11 = vld [vmem:[#allocation6 + $0x8] sm:$0xff]  }
  0x66   : > { %546 = vmatprep.subr.bf16.mxu0 %v1742_v14  ;;  %v1774_v12 = vld [vmem:[#allocation6] sm:$0xff]   ;;  %v1775_v13 = vld [vmem:[#allocation9 + $0x38] sm:$0xff]   ;;  %v1776_v14 = vld [vmem:[#allocation9 + $0x30] sm:$0xff]  }
  0x67   : > { %1483 = vmatpush3.bf16.msra.mxu1 %v1755_v21  ;;  %v1777_v15 = vld [vmem:[#allocation9 + $0x28] sm:$0xff]   ;;  %v1779_v21 = vld [vmem:[#allocation9 + $0x18] sm:$0xff]   ;;  %v1782_v44 = vld [vmem:[#allocation9] sm:$0xff]  }
  0x68   : > { %1484 = vmatprep.subr.bf16.mxu1 %v1953_v1 }
  0x69   : > { %547 = vmatpush1.bf16.msra.mxu0 %v1744_v16  ;;  %v1778_v16 = vld [vmem:[#allocation9 + $0x20] sm:$0xff]  }
  0x6a   : > { %548 = vmatprep.subr.bf16.mxu0 %v1745_v17 }
  0x6b   : > { %1485 = vmatpush3.bf16.msra.mxu1 %v1756_v23 }
  0x6c   : > { %1486 = vmatprep.subr.bf16.mxu1 %v1953_v1 }
  0x6d   : > { %549 = vmatpush1.bf16.msra.mxu0 %v1747_v19 }
  0x6e   : > { %550 = vmatprep.subr.bf16.mxu0 %v1748_v20 }
  0x6f   : > { %1487 = vmatpush3.bf16.msra.mxu1 %v1757_v26 }
  0x70   : > { %1488 = vmatprep.subr.bf16.mxu1 %v1953_v1 }
  0x71   : > { %551 = vmatpush1.bf16.msra.mxu0 %v1750_v22  ;;  %v1780_v22 = vld [vmem:[#allocation9 + $0x10] sm:$0xff]  }
  0x72   : > { %1494 = vmatprep.subr.mxu0 %v1953_v1 }
  0x73   : > { %1489 = vmatpush3.bf16.msra.mxu1 %v1758_v29 }
  0x74   : > { %569 = vmatmul.mubr.bf16.vlgmr.msra.gmra.mxu0 %v2116_v24  ;;  %1529 = vmatprep.subr.mxu1 %v1953_v1 }
  0x75   : > { %1495 = vmatpush3.msra.mxu0 %v2119_v25  ;;  %1526 = vmatprep.mubr.msk.f32.mxu0 %vm1954_vm0, %v1953_v1 }
  0x76   : > { %1496 = vmatprep.subr.mxu0 %v1953_v1  ;;  %1491 = vmatmul.mubr.bf16.vlgmr.msra.gmra.mxu1 %v2116_v24 }
  0x77   : > { %1497 = vmatpush3.msra.mxu0 %v2122_v27  ;;  %1530 = vmatpush3.msra.mxu1 %v2119_v25 }
  0x78   : > { %1498 = vmatprep.subr.mxu0 %v1953_v1  ;;  %1531 = vmatprep.subr.mxu1 %v1953_v1 }
  0x79   : > { %1499 = vmatpush3.msra.mxu0 %v2126_v28  ;;  %1532 = vmatpush3.msra.mxu1 %v2122_v27 }
  0x7a   : > { %1500 = vmatprep.subr.mxu0 %v1953_v1  ;;  %1533 = vmatprep.subr.mxu1 %v1953_v1 }
  0x7b   : > { %1501 = vmatpush3.msra.mxu0 %v2132_v30  ;;  %1534 = vmatpush3.msra.mxu1 %v2126_v28 }
  0x7c   : > { %1502 = vmatprep.subr.mxu0 %v1953_v1  ;;  %1535 = vmatprep.subr.mxu1 %v1953_v1 }
  0x7d   : > { %1503 = vmatpush3.msra.mxu0 %v2139_v31  ;;  %1536 = vmatpush3.msra.mxu1 %v2132_v30 }
  0x7e   : > { %1504 = vmatprep.subr.mxu0 %v1953_v1  ;;  %1537 = vmatprep.subr.mxu1 %v1953_v1 }
  0x7f   : > { %1505 = vmatpush3.msra.mxu0 %v2144_v32  ;;  %1538 = vmatpush3.msra.mxu1 %v2139_v31 }
  0x80   : > { %1506 = vmatprep.subr.mxu0 %v1953_v1  ;;  %1539 = vmatprep.subr.mxu1 %v1953_v1 }
  0x81   : > { %1507 = vmatpush3.msra.mxu0 %v2149_v33  ;;  %1540 = vmatpush3.msra.mxu1 %v2144_v32 }
  0x82   : > { %1508 = vmatprep.subr.mxu0 %v1953_v1  ;;  %1541 = vmatprep.subr.mxu1 %v1953_v1 }
  0x83   : > { %1509 = vmatpush3.msra.mxu0 %v2155_v34  ;;  %1542 = vmatpush3.msra.mxu1 %v2149_v33 }
  0x84   : > { %1510 = vmatprep.subr.mxu0 %v1953_v1  ;;  %1543 = vmatprep.subr.mxu1 %v1953_v1 }
  0x85   : > { %1511 = vmatpush3.msra.mxu0 %v2161_v35  ;;  %1544 = vmatpush3.msra.mxu1 %v2155_v34 }
  0x86   : > { %1512 = vmatprep.subr.mxu0 %v1953_v1  ;;  %1545 = vmatprep.subr.mxu1 %v1953_v1 }
  0x87   : > { %1513 = vmatpush3.msra.mxu0 %v2167_v36  ;;  %1546 = vmatpush3.msra.mxu1 %v2161_v35 }
  0x88   : > { %1514 = vmatprep.subr.mxu0 %v1953_v1  ;;  %1547 = vmatprep.subr.mxu1 %v1953_v1 }
  0x89   : > { %1515 = vmatpush3.msra.mxu0 %v2173_v37  ;;  %1548 = vmatpush3.msra.mxu1 %v2167_v36 }
  0x8a   : > { %1516 = vmatprep.subr.mxu0 %v1953_v1  ;;  %1561 = vmatprep.mubr.msk.f32.mxu1 %vm1954_vm0, %v1953_v1 }
  0x8b   : > { %1517 = vmatpush3.msra.mxu0 %v2179_v38  ;;  %1549 = vmatprep.subr.mxu1 %v1953_v1 }
  0x8c   : > { %1518 = vmatprep.subr.mxu0 %v1953_v1  ;;  %1550 = vmatpush3.msra.mxu1 %v2173_v37 }
  0x8d   : > { %1519 = vmatpush3.msra.mxu0 %v2185_v39  ;;  %1551 = vmatprep.subr.mxu1 %v1953_v1 }
  0x8e   : > { %1520 = vmatprep.subr.mxu0 %v1953_v1  ;;  %1552 = vmatpush3.msra.mxu1 %v2179_v38 }
  0x8f   : > { %1521 = vmatpush3.msra.mxu0 %v2191_v40  ;;  %1553 = vmatprep.subr.mxu1 %v1953_v1 }
  0x90   : > { %1522 = vmatprep.subr.mxu0 %v1953_v1  ;;  %1554 = vmatpush3.msra.mxu1 %v2185_v39 }
  0x91   : > { %1555 = vmatprep.subr.mxu1 %v1953_v1  ;;  %1523 = vmatpush3.msra.mxu0 %v618_v41 }
  0x92   : > { %1556 = vmatpush3.msra.mxu1 %v2191_v40  ;;  %1524 = vmatprep.subr.mxu0 %v1953_v1 }
  0x93   : > { %1557 = vmatprep.subr.mxu1 %v1953_v1  ;;  %1525 = vmatpush3.msra.mxu0 %v617_v42 }
  0x94   : > { %1558 = vmatpush3.msra.mxu1 %v618_v41  ;;  %1564 = vmatprep.subr.mxu0 %v1953_v1 }
  0x95   : > { %1559 = vmatprep.subr.mxu1 %v1953_v1 }
  0x96   : > { %1560 = vmatpush3.msra.mxu1 %v617_v42 }
  0x97   : > { %1599 = vmatprep.subr.bf16.mxu1 %v1953_v1 }
 0x134   : > { %v570_v46 = vpop.f32.mrf.mxu0 }
 0x136   : > { %v572_v47 = vpop.f32.mrf.mxu0  ;;  %v2231_v53 = vpop.f32.mrf.mxu1 }
 0x137   : > { %v633_v48 = vmul.f32 %v572_v47, %v570_v46  ;;  %v707_v49 = vrot.slane %v572_v47, %v706_v45  ;;  %v782_v58 = vrot.slane %v572_v47, %v781_v57 }
 0x138   : > { %v574_v50 = vpop.f32.mrf.mxu0  ;;  %v1492_v54 = vpop.f32.mrf.mxu1 }
 0x139   : > { %v708_v51 = vmul.f32 %v707_v49, %v570_v46  ;;  %1527 = vmatmul.mubr.f32.vlgmr.msra.gmra.mxu0 %v633_v48  ;;  %v783_v59 = vmul.f32 %v782_v58, %v570_v46  ;;  %v1781_v54 = vld [vmem:[#allocation9 + $0x8] sm:$0xff]  }
 0x13a   : > { %1565 = vmatpush3.msra.mxu0 %v2119_v25  ;;  %v575_v52 = vpop.f32.mrf.mxu0  ;;  %1596 = vmatprep.mubr.msk.f32.mxu0 %vm1954_vm0, %v1953_v1  ;;  %v614_v55 = vpop.f32.mrf.mxu1 }
 0x13b   : > { %1566 = vmatprep.subr.mxu0 %v1953_v1  ;;  %1562 = vmatmul.mubr.f32.vlgmr.msra.gmra.mxu1 %v708_v51  ;;  %v1375_v55 = vld [vmem:[%s2313_s5] ss:$0 sm:$0xff] }
 0x13c   : > { %1567 = vmatpush3.msra.mxu0 %v2122_v27  ;;  %1615 = vmatprep.mubr.msk.bf16.mxu1 %vm1954_vm0, %v1953_v1  ;;  %v1493_v56 = vpop.f32.mrf.mxu1 }
 0x13d   : > { %1568 = vmatprep.subr.mxu0 %v1953_v1  ;;  %1600 = vmatpush3.bf16.msra.mxu1 %v1759_v60 }
 0x13e   : > { %1569 = vmatpush3.msra.mxu0 %v2126_v28  ;;  %1601 = vmatprep.subr.bf16.mxu1 %v1953_v1 }
 0x13f   : > { %1570 = vmatprep.subr.mxu0 %v1953_v1 }
 0x140   : > { %1571 = vmatpush3.msra.mxu0 %v2132_v30 }
 0x141   : > { %1572 = vmatprep.subr.mxu0 %v1953_v1  ;;  %1602 = vmatpush3.bf16.msra.mxu1 %v1760_v61 }
 0x142   : > { %1573 = vmatpush3.msra.mxu0 %v2139_v31  ;;  %1603 = vmatprep.subr.bf16.mxu1 %v1953_v1 }
 0x143   : > { %1574 = vmatprep.subr.mxu0 %v1953_v1 }
 0x144   : > { %1575 = vmatpush3.msra.mxu0 %v2144_v32 }
 0x145   : > { %1576 = vmatprep.subr.mxu0 %v1953_v1  ;;  %1604 = vmatpush3.bf16.msra.mxu1 %v1762_v63 }
 0x146   : > { %1577 = vmatpush3.msra.mxu0 %v2149_v33  ;;  %1605 = vmatprep.subr.bf16.mxu1 %v1953_v1 }
 0x147   : > { %1578 = vmatprep.subr.mxu0 %v1953_v1 }
 0x148   : > { %1579 = vmatpush3.msra.mxu0 %v2155_v34  ;;  %v872_v34 = vrot.slane %v2231_v53, %v706_v45 }
 0x149   : > { %1580 = vmatprep.subr.mxu0 %v1953_v1  ;;  %1606 = vmatpush3.bf16.msra.mxu1 %v1764_v2 }
 0x14a   : > { %1581 = vmatpush3.msra.mxu0 %v2161_v35  ;;  %1607 = vmatprep.subr.bf16.mxu1 %v1953_v1 }
 0x14b   : > { %1582 = vmatprep.subr.mxu0 %v1953_v1 }
 0x14c   : > { %1583 = vmatpush3.msra.mxu0 %v2167_v36 }
 0x14d   : > { %1584 = vmatprep.subr.mxu0 %v1953_v1  ;;  %1608 = vmatpush3.bf16.msra.mxu1 %v1766_v4 }
 0x14e   : > { %1585 = vmatpush3.msra.mxu0 %v2173_v37  ;;  %1609 = vmatprep.subr.bf16.mxu1 %v1953_v1 }
 0x14f   : > { %1586 = vmatprep.subr.mxu0 %v1953_v1 }
 0x150   : > { %1587 = vmatpush3.msra.mxu0 %v2179_v38  ;;  %v878_v38 = vrot.slane %v2231_v53, %v781_v57 }
 0x151   : > { %1588 = vmatprep.subr.mxu0 %v1953_v1  ;;  %1610 = vmatpush3.bf16.msra.mxu1 %v1768_v6 }
 0x152   : > { %1589 = vmatpush3.msra.mxu0 %v2185_v39  ;;  %1611 = vmatprep.subr.bf16.mxu1 %v1953_v1 }
 0x153   : > { %1590 = vmatprep.subr.mxu0 %v1953_v1 }
 0x154   : > { %1591 = vmatpush3.msra.mxu0 %v2191_v40 }
 0x155   : > { %1592 = vmatprep.subr.mxu0 %v1953_v1  ;;  %1612 = vmatpush3.bf16.msra.mxu1 %v1770_v8 }
 0x156   : > { %1593 = vmatpush3.msra.mxu0 %v618_v41  ;;  %1613 = vmatprep.subr.bf16.mxu1 %v1953_v1 }
 0x157   : > { %1594 = vmatprep.subr.mxu0 %v1953_v1 }
 0x158   : > { %1595 = vmatpush3.msra.mxu0 %v617_v42 }
 0x159   : > { %1597 = vmatmul.mubr.f32.vlgmr.msra.gmra.mxu0 %v783_v59  ;;  %1619 = vmatprep.subr.bf16.mxu0 %v1953_v1 }
 0x15a   : > { %1635 = vmatprep.mubr.msk.bf16.mxu0 %vm1954_vm0, %v1953_v1  ;;  %1620 = vmatpush3.bf16.msra.mxu0 %v1761_v62 }
 0x15b   : > { %1621 = vmatprep.subr.bf16.mxu0 %v1953_v1  ;;  %1614 = vmatpush3.bf16.msra.mxu1 %v1772_v10 }
 0x15c   : > { %1639 = vmatprep.subr.bf16.mxu1 %v1953_v1 }
 0x15e   : > { %1622 = vmatpush3.bf16.msra.mxu0 %v1763_v0  ;;  %1616 = vmatmul.mubr.bf16.vlgmr.msra.gmra.mxu1 %v2116_v24 }
 0x15f   : > { %1623 = vmatprep.subr.bf16.mxu0 %v1953_v1  ;;  %1655 = vmatprep.mubr.msk.bf16.mxu1 %vm1954_vm0, %v1953_v1 }
 0x160   : > { %1640 = vmatpush3.bf16.msra.mxu1 %v1775_v13 }
 0x161   : > { %1641 = vmatprep.subr.bf16.mxu1 %v1953_v1 }
 0x162   : > { %1624 = vmatpush3.bf16.msra.mxu0 %v1765_v3 }
 0x163   : > { %1625 = vmatprep.subr.bf16.mxu0 %v1953_v1 }
 0x164   : > { %1642 = vmatpush3.bf16.msra.mxu1 %v1776_v14 }
 0x165   : > { %1643 = vmatprep.subr.bf16.mxu1 %v1953_v1 }
 0x166   : > { %1626 = vmatpush3.bf16.msra.mxu0 %v1767_v5 }
 0x167   : > { %1627 = vmatprep.subr.bf16.mxu0 %v1953_v1 }
 0x168   : > { %1644 = vmatpush3.bf16.msra.mxu1 %v1777_v15 }
 0x169   : > { %1645 = vmatprep.subr.bf16.mxu1 %v1953_v1 }
 0x16a   : > { %1628 = vmatpush3.bf16.msra.mxu0 %v1769_v7 }
 0x16b   : > { %1629 = vmatprep.subr.bf16.mxu0 %v1953_v1 }
 0x16c   : > { %1646 = vmatpush3.bf16.msra.mxu1 %v1778_v16 }
 0x16d   : > { %1647 = vmatprep.subr.bf16.mxu1 %v1953_v1 }
 0x16e   : > { %1630 = vmatpush3.bf16.msra.mxu0 %v1771_v9 }
 0x16f   : > { %1631 = vmatprep.subr.bf16.mxu0 %v1953_v1 }
 0x170   : > { %1648 = vmatpush3.bf16.msra.mxu1 %v1779_v21 }
 0x171   : > { %1649 = vmatprep.subr.bf16.mxu1 %v1953_v1 }
 0x172   : > { %1632 = vmatpush3.bf16.msra.mxu0 %v1773_v11 }
 0x173   : > { %1633 = vmatprep.subr.bf16.mxu0 %v1953_v1 }
 0x174   : > { %1650 = vmatpush3.bf16.msra.mxu1 %v1780_v22 }
 0x175   : > { %1651 = vmatprep.subr.bf16.mxu1 %v1953_v1 }
 0x176   : > { %1634 = vmatpush3.bf16.msra.mxu0 %v1774_v12 }
 0x178   : > { %1652 = vmatpush3.bf16.msra.mxu1 %v1781_v54 }
 0x179   : > { %1653 = vmatprep.subr.bf16.mxu1 %v1953_v1  ;;  %v1376_v1 = vld [vmem:[%s2315_s7] ss:$0 sm:$0xff] }
 0x17c   : > { %1654 = vmatpush3.bf16.msra.mxu1 %v1782_v44 }
 0x1f9   : > { %v700_v17 = vpop.f32.mrf.mxu0 }
 0x1fb   : > { %v1528_v18 = vpop.f32.mrf.mxu0  ;;  %v775_v19 = vpop.f32.mrf.mxu1 }
 0x1fc   : > { %v854_v23 = vmax.f32 %v700_v17, %v775_v19 }
 0x1fd   : > { %v1563_v20 = vpop.f32.mrf.mxu1 }
 0x219   : > { %v850_v24 = vpop.f32.mrf.mxu0 }
 0x21a   : > { %v855_v25 = vmax.f32 %v854_v23, %v850_v24 }
 0x21b   : > { %v1598_v26 = vpop.f32.mrf.mxu0 }
 0x21c   : > { %v856_v27 = vsub.f32 %v700_v17, %v855_v25  ;;  %v859_v28 = vsub.f32 %v775_v19, %v855_v25  ;;  %v862_v29 = vsub.f32 %v850_v24, %v855_v25 }
 0x21e   : > { %v857_v30 = vmul.f32 1.442695, %v856_v27  ;;  %v860_v31 = vmul.f32 1.442695, %v859_v28  ;;  %v863_v32 = vmul.f32 1.442695, %v862_v29  ;;  %v997_v45 = vpop.f32.mrf.mxu1 }
 0x220   : > { %1783 = vpow2.f32 %v857_v30  ;;  %v1617_v50 = vpop.f32.mrf.mxu1 }
 0x221   : > { %1785 = vpow2.f32 %v860_v31 }
 0x222   : > { %1787 = vpow2.f32 %v863_v32  ;;  %v1000_v51 = vpop.f32.mrf.mxu1 }
 0x224   : > { %v1618_v52 = vpop.f32.mrf.mxu1 }
 0x22d   : > { %v1784_v33 = vpop.eup %1783 }
 0x22e   : > { %v1786_v35 = vpop.eup %1785  ;;  %v868_v36 = vmul.f32 %v1784_v33, %v2231_v53 }
 0x22f   : > { %v1788_v37 = vpop.eup %1787  ;;  %v865_v39 = vadd.f32 %v1786_v35, %v1784_v33  ;;  %v873_v40 = vmul.f32 %v1786_v35, %v872_v34 }
 0x230   : > { %v879_v43 = vmul.f32 %v1788_v37, %v878_v38 }
 0x231   : > { %v866_v41 = vadd.f32 %v1788_v37, %v865_v39  ;;  %v874_v42 = vadd.f32 %v873_v40, %v868_v36 }
 0x233   : > { %1789 = vrcp.f32 %v866_v41  ;;  %v880_v46 = vadd.f32 %v879_v43, %v874_v42 }
 0x240   : > { %v1790_v47 = vpop.eup %1789 }
 0x241   : > { %v881_v48 = vmul.f32 %v1790_v47, %v880_v46 }
 0x243   : > { %v882_v49 = vpack.c.bf16 %v881_v48, %v881_v48 }
 0x245   : > { %1636 = vmatmul.mubr.bf16.vlgmr.msra.gmra.mxu0 %v882_v49 }
 0x305   : > { %v1085_v53 = vpop.f32.mrf.mxu0 }
 0x306   : > { %v1086_v56 = vadd.f32 %v1085_v53, %v997_v45 }
 0x307   : > { %v1637_v57 = vpop.f32.mrf.mxu0 }
 0x308   : > { %v1098_v58 = vadd.f32 %v1375_v55, %v1086_v56 }
 0x309   : > { %v1088_v59 = vpop.f32.mrf.mxu0 }
 0x30a   : > { %vm1099_vm1 = vcmp.ge.f32.partialorder %v1098_v58, 0.0  ;;  %v1100_v60 = vmul.f32 0.01, %v1098_v58 }
 0x30b   : > { %v1638_v61 = vpop.f32.mrf.mxu0 }
 0x30c   : > { %v1101_v62 = vsel %vm1099_vm1, %v1098_v58, %v1100_v60 }
 0x30d   : > { %v1102_v63 = vpack.c.bf16 %v1101_v62, %v1101_v62 }
 0x30f   : > { %1656 = vmatmul.mubr.bf16.vlgmr.msra.gmra.mxu1 %v1102_v63 }
 0x3cf   : > { %v1208_v0 = vpop.f32.mrf.mxu1 }
 0x3d0   : > { %v1209_v2 = vadd.f32 %v1376_v1, %v1208_v0 }
 0x3d1   : > { %v1657_v3 = vpop.f32.mrf.mxu1 }
 0x3d2   : > { %1214 = vst [vmem:[%s373_s16] sm:$0x1f] %v1209_v2 }
 0x3d3   : > { %v1211_v4 = vpop.f32.mrf.mxu1 }
 0x3d5   : > { %v1658_v5 = vpop.f32.mrf.mxu1 }
 0x3d6 PF: > { %s21_s27 = sadd.s32 1, %s1939_s27  }
 0x3d7   : > { %p18_p3 = scmp.ge.s32.totalorder %s21_s27, 4  }
 0x3d9   :  { %20 = sbr.rel (!%p18_p3) target bundleno = 3 (0x3), region = 103 }
 0x3de   :  { %1234 = vsyncpa [#allocation3], 1 }
 0x3df   :  { %1236 = vsyncpa [#allocation3 + $0x1], 1 }
 0x3e0   :  { %1237 = vsyncpa [#allocation5], 1 }
 0x3e1   :  { %1238 = vsyncpa [#allocation8], 1 }

</bundles_post_ra>
